<compile_context>
chip_gen: v5e
topology: v5e:2x2
jax: 0.10.0
libtpu: 0.0.40
codegen_flags: <defaults>
</compile_context>

<pallas_src>
import jax
import jax.numpy as jnp
from jax.experimental import pallas as pl
from jax.experimental.pallas import tpu as pltpu

_LANE = 128
_TM = 256     # Â row tile: multiple of 256 -> full MXU occupancy on v6e/v7x
_TK = 2048    # Â contraction (column) tile; multiple of _TM


def _round_up(x, m):
    return (x + m - 1) // m * m


def _pad2d(a, rows, cols, dtype):
    out = jnp.zeros((rows, cols), dtype)
    return out.at[: a.shape[0], : a.shape[1]].set(a.astype(dtype))


def _vmem_limit(footprint_bytes):
    # 4x headroom over the static tile footprint, clamped to [16 MiB, 64 MiB]
    # (64 MiB == v7x physical VMEM per TensorCore).
    return int(min(64 * 2**20, max(4 * footprint_bytes, 16 * 2**20)))


# ---------------------------------------------------------------------------
# Phase A: feature matmul  Z = X @ W   (row-tiled, weight resident in VMEM)
# ---------------------------------------------------------------------------
def _feature_matmul_kernel(x_ref, w_ref, o_ref):
    o_ref[...] = jnp.dot(
        x_ref[...], w_ref[...], preferred_element_type=jnp.float32
    ).astype(o_ref.dtype)


def _feature_matmul(x, w, *, tm):
    n, f = x.shape
    d = w.shape[1]
    footprint = 2 * (tm * f * 2 + f * d * 2 + tm * d * 2)
    return pl.pallas_call(
        _feature_matmul_kernel,
        out_shape=jax.ShapeDtypeStruct((n, d), jnp.bfloat16),
        grid_spec=pltpu.PrefetchScalarGridSpec(
            num_scalar_prefetch=0,
            grid=(n // tm,),
            in_specs=[
                pl.BlockSpec((tm, f), lambda i: (i, 0)),
                pl.BlockSpec((f, d), lambda i: (0, 0)),   # weight stays resident
            ],
            out_specs=pl.BlockSpec((tm, d), lambda i: (i, 0)),
        ),
        compiler_params=pltpu.CompilerParams(
            dimension_semantics=("parallel",),
            vmem_limit_bytes=_vmem_limit(footprint),
        ),
        cost_estimate=pl.CostEstimate(
            flops=2 * n * f * d,
            transcendentals=0,
            bytes_accessed=2 * (n * f + f * d + n * d),
        ),
    )(x, w)


# ---------------------------------------------------------------------------
# Phase B: aggregation  Y = f( Â @ Z [+ b] )   row-tiled + K-accumulated
# ---------------------------------------------------------------------------
def _make_aggregate_kernel(apply_relu, add_bias):
    def kernel(a_ref, z_ref, b_ref, o_ref, acc_ref):
        k = pl.program_id(1)

        @pl.when(k == 0)
        def _():
            acc_ref[...] = jnp.zeros_like(acc_ref)

        acc_ref[...] += jnp.dot(
            a_ref[...], z_ref[...], preferred_element_type=jnp.float32
        )

        # relu / bias / dtype cast only on the final K step (off the MXU hot loop).
        @pl.when(k == pl.num_programs(1) - 1)
        def _():
            out = acc_ref[...]
            if add_bias:
                out = out + b_ref[...]
            if apply_relu:
                out = jnp.maximum(out, 0.0)
            o_ref[...] = out.astype(o_ref.dtype)

    return kernel


def _aggregate(a, z, b, *, apply_relu, add_bias, out_dtype, tm, tk):
    n = a.shape[0]
    d = z.shape[1]
    out_itemsize = jnp.dtype(out_dtype).itemsize
    footprint = (
        2 * tm * tk * 2          # Â tiles, double-buffered bf16
        + 2 * tk * d * 2         # Z tiles, double-buffered bf16
        + 2 * d * 4              # bias
        + 2 * tm * d * out_itemsize
        + tm * d * 4             # f32 accumulator scratch
    )
    return pl.pallas_call(
        _make_aggregate_kernel(apply_relu, add_bias),
        out_shape=jax.ShapeDtypeStruct((n, d), out_dtype),
        grid_spec=pltpu.PrefetchScalarGridSpec(
            num_scalar_prefetch=0,
            grid=(n // tm, n // tk),
            in_specs=[
                pl.BlockSpec((tm, tk), lambda i, k: (i, k)),
                pl.BlockSpec((tk, d), lambda i, k: (k, 0)),
                pl.BlockSpec((1, d), lambda i, k: (0, 0)),
            ],
            out_specs=pl.BlockSpec((tm, d), lambda i, k: (i, 0)),
            scratch_shapes=[pltpu.VMEM((tm, d), jnp.float32)],
        ),
        compiler_params=pltpu.CompilerParams(
            dimension_semantics=("parallel", "arbitrary"),
            vmem_limit_bytes=_vmem_limit(footprint),
        ),
        cost_estimate=pl.CostEstimate(
            flops=2 * n * n * d,
            transcendentals=0,
            bytes_accessed=2 * n * n + 2 * n * d + 4 * d + out_itemsize * n * d,
        ),
    )(a, z, b)


# ---------------------------------------------------------------------------
# JAX glue: padding + the two-layer forward
# ---------------------------------------------------------------------------
def citgcn_forward(a_hat, x, w1, w2, b2, *, tm=_TM, tk=_TK):
    assert tk % tm == 0
    n, f = x.shape
    hid = w1.shape[1]
    c = w2.shape[1]

    np_ = _round_up(n, tm)
    tk_eff = min(tk, np_)
    if np_ % tk_eff:
        np_ = _round_up(np_, tk_eff)
    fp = _round_up(f, _LANE)
    hp = _round_up(hid, _LANE)
    cp = _round_up(c, _LANE)

    # bf16 operands, zero-padded so padded K lanes contribute exactly 0.
    a_p = _pad2d(a_hat, np_, np_, jnp.bfloat16)
    x_p = _pad2d(x, np_, fp, jnp.bfloat16)
    w1_p = _pad2d(w1, fp, hp, jnp.bfloat16)
    w2_p = _pad2d(w2, hp, cp, jnp.bfloat16)
    b1_p = jnp.zeros((1, hp), jnp.float32)                 # conv1: bias=False
    b2_p = _pad2d(b2.reshape(1, -1), 1, cp, jnp.float32)   # conv2: bias=True

    # dropout(p=0.5) on x and between layers is the identity at inference time.
    # ---- layer 1: h = relu( Â @ (X @ W1) ) ----
    xw1 = _feature_matmul(x_p, w1_p, tm=tm)
    h = _aggregate(a_p, xw1, b1_p, apply_relu=True, add_bias=False,
                   out_dtype=jnp.bfloat16, tm=tm, tk=tk_eff)

    # ---- layer 2: out = Â @ (h @ W2) + b2 ----
    hw2 = _feature_matmul(h, w2_p, tm=tm)
    out = _aggregate(a_p, hw2, b2_p, apply_relu=False, add_bias=True,
                     out_dtype=jnp.float32, tm=tm, tk=tk_eff)
    return out[:n, :c]


# Pure-JAX reference with the same bf16 operand / intermediate rounding.
def citgcn_reference(a_hat, x, w1, w2, b2):
    bf = lambda t: t.astype(jnp.bfloat16)
    xw1 = jnp.dot(bf(x), bf(w1), preferred_element_type=jnp.float32)
    h = jnp.maximum(jnp.dot(bf(a_hat), bf(xw1), preferred_element_type=jnp.float32), 0.0)
    hw2 = jnp.dot(bf(h), bf(w2), preferred_element_type=jnp.float32)
    out = jnp.dot(bf(a_hat), bf(hw2), preferred_element_type=jnp.float32)
    return out + b2[None, :]


# ---------------------------------------------------------------------------
# Synthetic graph: edge_index -> dense Â (mirrors PyG gcn_norm semantics:
# duplicate edges sum, self-loops added only where missing, symmetric D^-1/2)
# ---------------------------------------------------------------------------
def build_gcn_adjacency(key, num_nodes, num_edges):
    k_src, k_dst = jax.random.split(key)
    src = jax.random.randint(k_src, (num_edges,), 0, num_nodes)
    dst = jax.random.randint(k_dst, (num_edges,), 0, num_nodes)
    adj = jnp.zeros((num_nodes, num_nodes), jnp.float32).at[dst, src].add(1.0)
    diag = jnp.diagonal(adj)
    adj = adj + jnp.diag(jnp.where(diag > 0, 0.0, 1.0))   # add_remaining_self_loops
    deg = adj.sum(axis=1)
    d_inv_sqrt = jnp.where(deg > 0, jax.lax.rsqrt(deg), 0.0)
    return d_inv_sqrt[:, None] * adj * d_inv_sqrt[None, :]


if __name__ == "__main__":
    NUM_NODES = 16
    NUM_FEATURES = 16
    HIDDEN = 32
    NUM_CLASSES = 8
    NUM_EDGES = 48

    root = jax.random.PRNGKey(0)
    k_x, k_e, k_w1, k_w2, k_b = jax.random.split(root, 5)

    x = jax.random.normal(k_x, (NUM_NODES, NUM_FEATURES), jnp.float32)
    a_hat = build_gcn_adjacency(k_e, NUM_NODES, NUM_EDGES)
    # GCNConv weights already stored as (in, out); conv1 has no bias, conv2 has bias.
    w1 = 0.1 * jax.random.normal(k_w1, (NUM_FEATURES, HIDDEN), jnp.float32)
    w2 = 0.1 * jax.random.normal(k_w2, (HIDDEN, NUM_CLASSES), jnp.float32)
    b2 = 0.1 * jax.random.normal(k_b, (NUM_CLASSES,), jnp.float32)

    out = citgcn_forward(a_hat, x, w1, w2, b2)
    out = jax.block_until_ready(out)

    ref = citgcn_reference(a_hat, x, w1, w2, b2)
    assert out.shape == (NUM_NODES, NUM_CLASSES)
    assert bool(jnp.all(jnp.isfinite(out)))
    assert jnp.allclose(out, ref, atol=1e-2, rtol=1e-2), float(jnp.max(jnp.abs(out - ref)))
    print("KERNEL_OK")
</pallas_src>

<mosaic_0001>
module attributes {stable_mosaic.version = 11 : i64} {
  func.func @_feature_matmul_kernel(%arg0: i32, %arg1: memref<256x128xbf16, #tpu.memory_space<vmem>>, %arg2: memref<128x128xbf16, #tpu.memory_space<vmem>>, %arg3: memref<256x128xbf16, #tpu.memory_space<vmem>>) attributes {dimension_semantics = [#tpu.dimension_semantics<parallel>], iteration_bounds = array<i64: 1>, scalar_prefetch = 0 : i64, scratch_operands = 0 : i64, tpu.core_type = #tpu.core_type<tc>, window_params = [{transform_indices = @transform_0, window_bounds = array<i64: 256, 128>}, {pipeline_mode = #tpu.pipeline_mode<synchronous>, transform_indices = @transform_1, window_bounds = array<i64: 128, 128>}, {transform_indices = @transform_2, window_bounds = array<i64: 256, 128>}]} {
    %c0 = arith.constant 0 : index
    %c0_0 = arith.constant 0 : index
    %0 = vector.load %arg1[%c0, %c0_0] : memref<256x128xbf16, #tpu.memory_space<vmem>>, vector<256x128xbf16>
    %c0_1 = arith.constant 0 : index
    %c0_2 = arith.constant 0 : index
    %1 = vector.load %arg2[%c0_1, %c0_2] : memref<128x128xbf16, #tpu.memory_space<vmem>>, vector<128x128xbf16>
    %cst = arith.constant dense<0.000000e+00> : vector<256x128xf32>
    %2 = tpu.matmul %0, %1, %cst {dimension_numbers = #tpu.dot_dimension_numbers<[1], [0], [0], [1], [0, 0, 1, 1], [], []>} : vector<256x128xbf16>, vector<128x128xbf16>, vector<256x128xf32> -> vector<256x128xf32>
    %3 = arith.truncf %2 : vector<256x128xf32> to vector<256x128xbf16>
    %c0_3 = arith.constant 0 : index
    %c0_4 = arith.constant 0 : index
    %4 = vector.load %arg3[%c0_3, %c0_4] : memref<256x128xbf16, #tpu.memory_space<vmem>>, vector<256x128xbf16>
    tpu.vector_store %arg3[%c0_3, %c0_4], %3 {strides = array<i32>} : memref<256x128xbf16, #tpu.memory_space<vmem>>, vector<256x128xbf16>,
    return
  }
  func.func @transform_0(%arg0: i32) -> (i32, i32) {
    %c0_i32 = arith.constant 0 : i32
    %c0_i32_0 = arith.constant 0 : i32
    return %arg0, %c0_i32 : i32, i32
  }
  func.func @transform_1(%arg0: i32) -> (i32, i32) {
    %c0_i32 = arith.constant 0 : i32
    %c0_i32_0 = arith.constant 0 : i32
    %c0_i32_1 = arith.constant 0 : i32
    return %c0_i32, %c0_i32_0 : i32, i32
  }
  func.func @transform_2(%arg0: i32) -> (i32, i32) {
    %c0_i32 = arith.constant 0 : i32
    %c0_i32_0 = arith.constant 0 : i32
    return %arg0, %c0_i32 : i32, i32
  }
}

</mosaic_0001>

<bundles_post_ra>
// kernel: tpu_custom_call.1
= control target key start
LH: loop header
LB: loop body
LE: loop exit
PB: predicated region body
PF: predicated region fallthrough
CT: control target
= control target key end

     0   :  { %7 = vsyncpa [#allocation3], 0  ;;  %s769_s0 = inlined_call_operand.hbm [shape: bf16[256,128], index: 0, kind: input, shape index: {}]   ;;  %s770_s1 = inlined_call_operand.hbm [shape: bf16[128,128], index: 1, kind: input, shape index: {}]   ;;  %s771_s2 = inlined_call_operand.hbm [shape: bf16[256,128], index: 2, kind: output, shape index: {}]  }
   0x1   :  { %8 = vsyncpa [#allocation6], 0 }
   0x2   :  { %9 = vsyncpa [#allocation4], 0  ;;  %s14_s11 = sshll.u32 %s769_s0, 4  ;;  %s731_s12 = smov [#allocation2]   ;;  %s15_s11 = int_to_ptr.hbm [resolvable:$true] %s14_s11 }
   0x3   :  { %s16_s13 = sshll.u32 %s731_s12, 4  ;;  %s27_s16 = sshll.u32 %s770_s1, 4  ;;  %s17_s13 = int_to_ptr.vmem [resolvable:$true] %s16_s13  ;;  %s28_s16 = int_to_ptr.hbm [resolvable:$true] %s27_s16 }
   0x4   :  { %s732_s17 = smov 64   ;;  %s733_s18 = smov 4  }
   0x5   :  { %22 = dma.hbm_to_vmem [thread:$0]  %s15_s11, 2048, %s17_s13, [#allocation3], %s732_s17, %s732_s17, %s733_s18  }
   0x6   :  { %s734_s19 = smov [#allocation5]  }
   0x7   :  { %s29_s20 = sshll.u32 %s734_s19, 4  ;;  %s30_s20 = int_to_ptr.vmem [resolvable:$true] %s29_s20 }
   0x8   :  { %35 = dma.hbm_to_vmem [thread:$0]  %s28_s16, 1024, %s30_s20, [#allocation6], %s732_s17, %s732_s17, %s733_s18  }
   0x9   :  { %725 = dma.done.wait [#allocation3], 2048  }
   0xa   :  { %726 = vsyncadd [#allocation3], 4294965248 }
   0xb   :  { %727 = dma.done.wait [#allocation6], 1024  }
   0xc   :  { %728 = vsyncadd [#allocation6], 4294966272  ;;  %v528_v0 = vld [vmem:[#allocation5 + $0x38] sm:$0xff]  ;;  %v527_v1 = vld [vmem:[#allocation5 + $0x30] sm:$0xff]  ;;  %s735_s0 = smov [#allocation7]   ;;  %s395_s23 = sshll.u32 %s771_s2, 4  ;;  %s396_s23 = int_to_ptr.hbm [resolvable:$true] %s395_s23 }
   0xd   :  { %236 = vmatpush.bf16.msra.mxu0 %v528_v0  ;;  %624 = vmatpush.bf16.msra.mxu1 %v528_v0  ;;  %v526_v2 = vld [vmem:[#allocation5 + $0x28] sm:$0xff]  ;;  %v525_v3 = vld [vmem:[#allocation5 + $0x20] sm:$0xff]  ;;  %v524_v4 = vld [vmem:[#allocation5 + $0x18] sm:$0xff]  ;;  %s393_s1 = sshll.u32 %s735_s0, 4  ;;  %s394_s1 = int_to_ptr.vmem [resolvable:$true] %s393_s1 }
   0xe   :  { %625 = vmatpush.bf16.msra.mxu2 %v528_v0  ;;  %626 = vmatpush.bf16.msra.mxu3 %v528_v0  ;;  %v523_v5 = vld [vmem:[#allocation5 + $0x10] sm:$0xff]  ;;  %v522_v6 = vld [vmem:[#allocation5 + $0x8] sm:$0xff]  ;;  %v521_v7 = vld [vmem:[#allocation5] sm:$0xff] }
   0xf   :  { %v505_v8 = vld [vmem:[#allocation2] sm:$0xff]  ;;  %v506_v12 = vld [vmem:[#allocation2 + $0x8] sm:$0xff]  ;;  %v507_v16 = vld [vmem:[#allocation2 + $0x10] sm:$0xff] }
  0x10   :  { %v509_v9 = vld [vmem:[#allocation2 + $0x20] sm:$0xff]  ;;  %v510_v13 = vld [vmem:[#allocation2 + $0x28] sm:$0xff]  ;;  %v511_v17 = vld [vmem:[#allocation2 + $0x30] sm:$0xff] }
  0x11   :  { %237 = vmatpush.bf16.msra.mxu0 %v527_v1  ;;  %627 = vmatpush.bf16.msra.mxu1 %v527_v1  ;;  %v513_v10 = vld [vmem:[#allocation2 + $0x40] sm:$0xff]  ;;  %v514_v14 = vld [vmem:[#allocation2 + $0x48] sm:$0xff]  ;;  %v515_v18 = vld [vmem:[#allocation2 + $0x50] sm:$0xff] }
  0x12   :  { %628 = vmatpush.bf16.msra.mxu2 %v527_v1  ;;  %629 = vmatpush.bf16.msra.mxu3 %v527_v1  ;;  %v517_v11 = vld [vmem:[#allocation2 + $0x60] sm:$0xff]  ;;  %v518_v15 = vld [vmem:[#allocation2 + $0x68] sm:$0xff]  ;;  %v519_v19 = vld [vmem:[#allocation2 + $0x70] sm:$0xff] }
  0x13   :  { %v508_v20 = vld [vmem:[#allocation2 + $0x18] sm:$0xff] }
  0x14   :  { %v512_v21 = vld [vmem:[#allocation2 + $0x38] sm:$0xff] }
  0x15   :  { %238 = vmatpush.bf16.msra.mxu0 %v526_v2  ;;  %630 = vmatpush.bf16.msra.mxu1 %v526_v2  ;;  %v516_v22 = vld [vmem:[#allocation2 + $0x58] sm:$0xff] }
  0x16   :  { %631 = vmatpush.bf16.msra.mxu2 %v526_v2  ;;  %632 = vmatpush.bf16.msra.mxu3 %v526_v2  ;;  %v520_v23 = vld [vmem:[#allocation2 + $0x78] sm:$0xff] }
  0x19   :  { %239 = vmatpush.bf16.msra.mxu0 %v525_v3  ;;  %633 = vmatpush.bf16.msra.mxu1 %v525_v3 }
  0x1a   :  { %634 = vmatpush.bf16.msra.mxu2 %v525_v3  ;;  %635 = vmatpush.bf16.msra.mxu3 %v525_v3 }
  0x1d   :  { %240 = vmatpush.bf16.msra.mxu0 %v524_v4  ;;  %636 = vmatpush.bf16.msra.mxu1 %v524_v4 }
  0x1e   :  { %637 = vmatpush.bf16.msra.mxu2 %v524_v4  ;;  %638 = vmatpush.bf16.msra.mxu3 %v524_v4 }
  0x21   :  { %241 = vmatpush.bf16.msra.mxu0 %v523_v5  ;;  %639 = vmatpush.bf16.msra.mxu1 %v523_v5 }
  0x22   :  { %640 = vmatpush.bf16.msra.mxu2 %v523_v5  ;;  %641 = vmatpush.bf16.msra.mxu3 %v523_v5 }
  0x25   :  { %242 = vmatpush.bf16.msra.mxu0 %v522_v6  ;;  %642 = vmatpush.bf16.msra.mxu1 %v522_v6 }
  0x26   :  { %643 = vmatpush.bf16.msra.mxu2 %v522_v6  ;;  %644 = vmatpush.bf16.msra.mxu3 %v522_v6 }
  0x29   :  { %243 = vmatpush.bf16.msra.mxu0 %v521_v7  ;;  %645 = vmatpush.bf16.msra.mxu1 %v521_v7 }
  0x2a   :  { %646 = vmatpush.bf16.msra.mxu2 %v521_v7  ;;  %647 = vmatpush.bf16.msra.mxu3 %v521_v7 }
  0x2c   :  { %244 = vmatmul.bf16.vlgmr.msra.gmra.mxu0 %v505_v8  ;;  %264 = vmatmul.bf16.vlgmr.msra.gmra.mxu1 %v509_v9 }
  0x2d   :  { %284 = vmatmul.bf16.vlgmr.msra.gmra.mxu2 %v513_v10  ;;  %304 = vmatmul.bf16.vlgmr.msra.gmra.mxu3 %v517_v11 }
  0x3c   :  { %249 = vmatmul.bf16.gmra.mxu0 %v506_v12  ;;  %269 = vmatmul.bf16.gmra.mxu1 %v510_v13 }
  0x3d   :  { %289 = vmatmul.bf16.gmra.mxu2 %v514_v14  ;;  %309 = vmatmul.bf16.gmra.mxu3 %v518_v15 }
  0x4c   :  { %254 = vmatmul.bf16.gmra.mxu0 %v507_v16  ;;  %274 = vmatmul.bf16.gmra.mxu1 %v511_v17 }
  0x4d   :  { %294 = vmatmul.bf16.gmra.mxu2 %v515_v18  ;;  %314 = vmatmul.bf16.gmra.mxu3 %v519_v19 }
  0x5c   :  { %259 = vmatmul.bf16.gmra.mxu0 %v508_v20  ;;  %279 = vmatmul.bf16.gmra.mxu1 %v512_v21 }
  0x5d   :  { %299 = vmatmul.bf16.gmra.mxu2 %v516_v22  ;;  %319 = vmatmul.bf16.gmra.mxu3 %v520_v23 }
  0xa9   :  { %v245_v24 = vpop.f32.mrf.mxu0  ;;  %v265_v25 = vpop.f32.mrf.mxu1 }
  0xb0   :  { %v285_v26 = vpop.f32.mrf.mxu2  ;;  %v305_v27 = vpop.f32.mrf.mxu3 }
  0xb1   :  { %v247_v28 = vpop.f32.mrf.mxu0  ;;  %v267_v29 = vpop.f32.mrf.mxu1 }
  0xb2   :  { %v532_v30 = vpack.c.bf16 %v247_v28, %v245_v24  ;;  %v552_v31 = vpack.c.bf16 %v267_v29, %v265_v25 }
  0xb4   :  { %533 = vst [vmem:[#allocation7] sm:$0xff] %v532_v30  }
  0xb5   :  { %612 = vst [vmem:[#allocation7 + $0x20] sm:$0xff] %v552_v31  }
  0xb8   :  { %v287_v32 = vpop.f32.mrf.mxu2  ;;  %v307_v33 = vpop.f32.mrf.mxu3 }
  0xb9   :  { %v572_v34 = vpack.c.bf16 %v287_v32, %v285_v26  ;;  %v592_v35 = vpack.c.bf16 %v307_v33, %v305_v27  ;;  %v250_v36 = vpop.f32.mrf.mxu0  ;;  %v270_v37 = vpop.f32.mrf.mxu1 }
  0xbb   :  { %616 = vst [vmem:[#allocation7 + $0x40] sm:$0xff] %v572_v34  }
  0xbc   :  { %620 = vst [vmem:[#allocation7 + $0x60] sm:$0xff] %v592_v35  }
  0xc0   :  { %v290_v38 = vpop.f32.mrf.mxu2  ;;  %v310_v39 = vpop.f32.mrf.mxu3 }
  0xc1   :  { %v252_v40 = vpop.f32.mrf.mxu0  ;;  %v272_v41 = vpop.f32.mrf.mxu1 }
  0xc2   :  { %v537_v42 = vpack.c.bf16 %v252_v40, %v250_v36  ;;  %v557_v43 = vpack.c.bf16 %v272_v41, %v270_v37 }
  0xc4   :  { %609 = vst [vmem:[#allocation7 + $0x8] sm:$0xff] %v537_v42  }
  0xc5   :  { %613 = vst [vmem:[#allocation7 + $0x28] sm:$0xff] %v557_v43  }
  0xc8   :  { %v292_v44 = vpop.f32.mrf.mxu2  ;;  %v312_v45 = vpop.f32.mrf.mxu3 }
  0xc9   :  { %v577_v46 = vpack.c.bf16 %v292_v44, %v290_v38  ;;  %v597_v47 = vpack.c.bf16 %v312_v45, %v310_v39  ;;  %v255_v48 = vpop.f32.mrf.mxu0  ;;  %v275_v49 = vpop.f32.mrf.mxu1 }
  0xcb   :  { %617 = vst [vmem:[#allocation7 + $0x48] sm:$0xff] %v577_v46  }
  0xcc   :  { %621 = vst [vmem:[#allocation7 + $0x68] sm:$0xff] %v597_v47  }
  0xd0   :  { %v295_v50 = vpop.f32.mrf.mxu2  ;;  %v315_v51 = vpop.f32.mrf.mxu3 }
  0xd1   :  { %v257_v52 = vpop.f32.mrf.mxu0  ;;  %v277_v53 = vpop.f32.mrf.mxu1 }
  0xd2   :  { %v542_v54 = vpack.c.bf16 %v257_v52, %v255_v48  ;;  %v562_v55 = vpack.c.bf16 %v277_v53, %v275_v49 }
  0xd4   :  { %610 = vst [vmem:[#allocation7 + $0x10] sm:$0xff] %v542_v54  }
  0xd5   :  { %614 = vst [vmem:[#allocation7 + $0x30] sm:$0xff] %v562_v55  }
  0xd8   :  { %v297_v56 = vpop.f32.mrf.mxu2  ;;  %v317_v57 = vpop.f32.mrf.mxu3 }
  0xd9   :  { %v582_v58 = vpack.c.bf16 %v297_v56, %v295_v50  ;;  %v602_v59 = vpack.c.bf16 %v317_v57, %v315_v51  ;;  %v260_v60 = vpop.f32.mrf.mxu0  ;;  %v280_v61 = vpop.f32.mrf.mxu1 }
  0xdb   :  { %618 = vst [vmem:[#allocation7 + $0x50] sm:$0xff] %v582_v58  }
  0xdc   :  { %622 = vst [vmem:[#allocation7 + $0x70] sm:$0xff] %v602_v59  }
  0xe0   :  { %v300_v62 = vpop.f32.mrf.mxu2  ;;  %v320_v63 = vpop.f32.mrf.mxu3 }
  0xe1   :  { %v262_v0 = vpop.f32.mrf.mxu0  ;;  %v282_v1 = vpop.f32.mrf.mxu1 }
  0xe2   :  { %v547_v2 = vpack.c.bf16 %v262_v0, %v260_v60  ;;  %v567_v3 = vpack.c.bf16 %v282_v1, %v280_v61 }
  0xe4   :  { %611 = vst [vmem:[#allocation7 + $0x18] sm:$0xff] %v547_v2  }
  0xe5   :  { %615 = vst [vmem:[#allocation7 + $0x38] sm:$0xff] %v567_v3  }
  0xe8   :  { %v302_v4 = vpop.f32.mrf.mxu2  ;;  %v322_v5 = vpop.f32.mrf.mxu3 }
  0xe9   :  { %v587_v6 = vpack.c.bf16 %v302_v4, %v300_v62  ;;  %v607_v7 = vpack.c.bf16 %v322_v5, %v320_v63 }
  0xeb   :  { %619 = vst [vmem:[#allocation7 + $0x58] sm:$0xff] %v587_v6  }
  0xec   :  { %623 = vst [vmem:[#allocation7 + $0x78] sm:$0xff] %v607_v7  }
  0xed   :  { %401 = dma.vmem_to_hbm [thread:$0]  %s394_s1, 2048, %s396_s23, [#allocation4], %s732_s17, %s732_s17, %s733_s18  }
  0xee   :  { %729 = dma.done.wait [#allocation4], 2048  }
  0xef   :  { %730 = vsyncadd [#allocation4], 4294965248 }
  0xf0   :  { %406 = vsyncpa [#allocation3], 1 }
  0xf1   :  { %407 = vsyncpa [#allocation6], 1 }
  0xf2   :  { %408 = vsyncpa [#allocation4], 1 }

</bundles_post_ra>
